<compile_context>
chip_gen: v7x
topology: tpu7x:2x2x1
jax: 0.10.0
libtpu: 0.0.40
codegen_flags: <defaults>
</compile_context>

<pallas_src>
import functools
import math

import jax
import jax.numpy as jnp
from jax.experimental import pallas as pl
from jax.experimental.pallas import tpu as pltpu


# --------------------------- chip-adaptive config ---------------------------

@functools.lru_cache(maxsize=None)
def _chip_config():
    """Return (tm, tn, tk, vmem_limit_bytes) sized per TPU generation."""
    vmem_cap = 128 * 1024 * 1024
    try:
        info = pltpu.get_tpu_info()
        vmem_cap = int(getattr(info, "vmem_capacity_bytes", vmem_cap))
    except Exception:
        pass
    if vmem_cap <= 64 * 1024 * 1024:            # v7x-class: 64 MiB physical VMEM
        return 256, 256, 256, 48 * 1024 * 1024
    return 256, 256, 512, 64 * 1024 * 1024      # v5e / v6e: 128 MiB physical VMEM


def _tile(dim, pref):
    """Pick a block size and padded extent for one dimension."""
    if dim <= pref:
        return dim, dim                          # full-extent block (always legal)
    padded = ((dim + pref - 1) // pref) * pref
    return pref, padded


def _pad2(a, rows, cols):
    r, c = a.shape
    if r == rows and c == cols:
        return a
    return jnp.pad(a, ((0, rows - r), (0, cols - c)))


def _exact_gelu(y):
    # nn.GELU default (exact erf form), fp32.
    return 0.5 * y * (1.0 + jax.lax.erf(y * (1.0 / math.sqrt(2.0))))


# ------------------------ fused tiled linear kernel --------------------------

def _fused_linear_kernel(*refs, nk, fuse_ln, fuse_res, activation, l2norm):
    it = iter(refs)
    x_ref, w_ref, b_ref = next(it), next(it), next(it)
    g_ref = bt_ref = r_ref = None
    if fuse_ln:
        g_ref, bt_ref = next(it), next(it)
    if fuse_res:
        r_ref = next(it)
    o_ref, acc_ref = next(it), next(it)

    @pl.when(pl.program_id(2) == 0)
    def _():
        acc_ref[...] = jnp.zeros_like(acc_ref)

    x = x_ref[...]                                   # fp32 activations tile
    if fuse_ln:
        mean = jnp.mean(x, axis=-1, keepdims=True)
        var = jnp.mean(jnp.square(x - mean), axis=-1, keepdims=True)
        x = (x - mean) * jax.lax.rsqrt(var + 1e-5)
        x = x * g_ref[...] + bt_ref[...]
    # bf16 MXU operands, fp32 accumulation.
    acc_ref[...] += jnp.dot(x.astype(jnp.bfloat16), w_ref[...],
                            preferred_element_type=jnp.float32)

    @pl.when(pl.program_id(2) == nk - 1)
    def _():
        y = acc_ref[...] + b_ref[...]
        if activation == "gelu":
            y = _exact_gelu(y)
        if fuse_res:
            y = y + r_ref[...]
        if l2norm:
            # F.normalize(dim=-1, eps=1e-12); valid because this tile holds the
            # full output row (gated in the wrapper) and padded cols are zeros.
            norm = jnp.sqrt(jnp.sum(y * y, axis=-1, keepdims=True))
            y = y / jnp.maximum(norm, 1e-12)
        o_ref[...] = y.astype(o_ref.dtype)


def fused_linear(x, w, b=None, *, ln=None, activation=None, residual=None,
                 l2_normalize=False):
    """y = act(LN?(x) @ w + b) (+ residual) (-> L2 normalize?).

    x:[M,K] f32, w:[K,N] bf16 (pre-transposed), b:[N] f32 or None.
    """
    M, K = x.shape
    Kw, N = w.shape
    assert K == Kw
    tm_pref, tn_pref, tk_pref, vmem_limit = _chip_config()
    tm, Mp = _tile(M, tm_pref)
    tn, Np = _tile(N, tn_pref)
    if ln is not None:
        tk, Kp = K, K                                # LN needs the full feature row
    else:
        tk, Kp = _tile(K, tk_pref)

    # Fused L2-normalize is only legal when the whole output row is in one tile.
    fuse_l2 = bool(l2_normalize) and (tn == Np)

    x_p = _pad2(x.astype(jnp.float32), Mp, Kp)
    w_p = _pad2(w.astype(jnp.bfloat16), Kp, Np)
    b_arr = jnp.zeros((N,), jnp.float32) if b is None else jnp.asarray(b, jnp.float32)
    b_p = _pad2(b_arr.reshape(1, N), 1, Np)

    inputs = [x_p, w_p, b_p]
    in_specs = [
        pl.BlockSpec((tm, tk), lambda i, j, k: (i, k)),
        pl.BlockSpec((tk, tn), lambda i, j, k: (k, j)),
        pl.BlockSpec((1, tn), lambda i, j, k: (0, j)),
    ]
    if ln is not None:
        g, beta = ln
        inputs += [
            _pad2(jnp.asarray(g, jnp.float32).reshape(1, K), 1, Kp),
            _pad2(jnp.asarray(beta, jnp.float32).reshape(1, K), 1, Kp),
        ]
        in_specs += [
            pl.BlockSpec((1, tk), lambda i, j, k: (0, k)),
            pl.BlockSpec((1, tk), lambda i, j, k: (0, k)),
        ]
    if residual is not None:
        inputs.append(_pad2(residual.astype(jnp.float32), Mp, Np))
        in_specs.append(pl.BlockSpec((tm, tn), lambda i, j, k: (i, j)))

    nk = Kp // tk
    grid = (Mp // tm, Np // tn, nk)
    kernel = functools.partial(
        _fused_linear_kernel, nk=nk, fuse_ln=ln is not None,
        fuse_res=residual is not None, activation=activation, l2norm=fuse_l2)

    out = pl.pallas_call(
        kernel,
        grid=grid,
        out_shape=jax.ShapeDtypeStruct((Mp, Np), jnp.float32),
        in_specs=in_specs,
        out_specs=pl.BlockSpec((tm, tn), lambda i, j, k: (i, j)),
        scratch_shapes=[pltpu.VMEM((tm, tn), jnp.float32)],
        compiler_params=pltpu.CompilerParams(
            dimension_semantics=("parallel", "parallel", "arbitrary"),
            vmem_limit_bytes=vmem_limit),
        cost_estimate=pl.CostEstimate(
            flops=2 * Mp * Np * Kp,
            transcendentals=Mp * Np if activation == "gelu" else 0,
            bytes_accessed=Mp * Kp * 4 + Kp * Np * 2 + Mp * Np * 4),
    )(*inputs)
    if (Mp, Np) != (M, N):
        out = out[:M, :N]
    if l2_normalize and not fuse_l2:
        out = pallas_l2_normalize(out)               # fallback when N is tiled
    return out


# ----------------------------- layernorm kernel ------------------------------

def _layernorm_kernel(x_ref, g_ref, b_ref, o_ref):
    x = x_ref[...]
    mean = jnp.mean(x, axis=-1, keepdims=True)
    var = jnp.mean(jnp.square(x - mean), axis=-1, keepdims=True)
    o_ref[...] = (x - mean) * jax.lax.rsqrt(var + 1e-5) * g_ref[...] + b_ref[...]


def pallas_layernorm(x, g, b):
    """Standalone LN (only used for ln_pre; all other LNs are fused into matmuls)."""
    M, D = x.shape
    tm_pref, _, _, vmem_limit = _chip_config()
    tm, Mp = _tile(M, tm_pref)
    x_p = _pad2(x.astype(jnp.float32), Mp, D)
    out = pl.pallas_call(
        _layernorm_kernel,
        grid=(Mp // tm,),
        out_shape=jax.ShapeDtypeStruct((Mp, D), jnp.float32),
        in_specs=[pl.BlockSpec((tm, D), lambda i: (i, 0)),
                  pl.BlockSpec((1, D), lambda i: (0, 0)),
                  pl.BlockSpec((1, D), lambda i: (0, 0))],
        out_specs=pl.BlockSpec((tm, D), lambda i: (i, 0)),
        compiler_params=pltpu.CompilerParams(
            dimension_semantics=("parallel",), vmem_limit_bytes=vmem_limit),
    )(x_p,
      jnp.asarray(g, jnp.float32).reshape(1, D),
      jnp.asarray(b, jnp.float32).reshape(1, D))
    return out[:M] if Mp != M else out


# ------------------------------ attention kernel -----------------------------

def _attn_kernel(qkv_ref, o_ref, *, n_heads, d_head, scale, causal):
    D = n_heads * d_head
    qkv = qkv_ref[0]                                 # (L, 3D) fp32
    L = qkv.shape[0]
    if causal:
        row = jax.lax.broadcasted_iota(jnp.int32, (L, L), 0)
        col = jax.lax.broadcasted_iota(jnp.int32, (L, L), 1)
        mask = jnp.where(col > row, jnp.float32(-1e30), jnp.float32(0.0))
    outs = []
    for h in range(n_heads):                         # static unroll over heads
        q = qkv[:, h * d_head:(h + 1) * d_head]
        k = qkv[:, D + h * d_head:D + (h + 1) * d_head]
        v = qkv[:, 2 * D + h * d_head:2 * D + (h + 1) * d_head]
        # contract on head dim (no explicit k.T / XLU transpose)
        s = jax.lax.dot_general(
            q.astype(jnp.bfloat16), k.astype(jnp.bfloat16),
            (((1,), (1,)), ((), ())),
            preferred_element_type=jnp.float32) * scale
        if causal:
            s = s + mask
        s = s - jnp.max(s, axis=-1, keepdims=True)   # fp32 softmax statistics
        p = jnp.exp(s)
        denom = jnp.sum(p, axis=-1, keepdims=True)
        p = p * pl.reciprocal(denom, approx=True)    # EUP reciprocal
        outs.append(jnp.dot(p.astype(jnp.bfloat16), v.astype(jnp.bfloat16),
                            preferred_element_type=jnp.float32))
    o_ref[0] = jnp.concatenate(outs, axis=-1)        # single lane-dense (L, D) store


def pallas_attention(qkv, n_heads, causal):
    """Self-attention core. qkv: [B, L, 3D] (q|k|v packed on last dim) -> [B, L, D]."""
    B, L, threeD = qkv.shape
    D = threeD // 3
    d_head = D // n_heads
    _, _, _, vmem_limit = _chip_config()
    return pl.pallas_call(
        functools.partial(_attn_kernel, n_heads=n_heads, d_head=d_head,
                          scale=1.0 / math.sqrt(d_head), causal=causal),
        grid=(B,),
        out_shape=jax.ShapeDtypeStruct((B, L, D), jnp.float32),
        in_specs=[pl.BlockSpec((1, L, threeD), lambda b: (b, 0, 0))],
        out_specs=pl.BlockSpec((1, L, D), lambda b: (b, 0, 0)),
        compiler_params=pltpu.CompilerParams(
            dimension_semantics=("parallel",), vmem_limit_bytes=vmem_limit),
    )(qkv.astype(jnp.float32))


# ------------------------------- L2 normalize --------------------------------

def _l2norm_kernel(x_ref, o_ref):
    x = x_ref[...]
    n = jnp.sqrt(jnp.sum(x * x, axis=-1, keepdims=True))
    o_ref[...] = x / jnp.maximum(n, 1e-12)           # F.normalize eps=1e-12


def pallas_l2_normalize(x):
    M, D = x.shape
    return pl.pallas_call(
        _l2norm_kernel,
        out_shape=jax.ShapeDtypeStruct((M, D), jnp.float32),
        in_specs=[pl.BlockSpec((M, D), lambda *a: (0, 0))],
        out_specs=pl.BlockSpec((M, D), lambda *a: (0, 0)),
    )(x.astype(jnp.float32))


# ------------------------- model forward (glue + kernels) --------------------

def residual_block(x2d, B, L, p, n_heads, causal):
    """x = x + attn(ln_1(x));  x = x + mlp(ln_2(x))   (ls_* identity)."""
    D = x2d.shape[-1]
    # LN1 fused into QKV projection.
    qkv = fused_linear(x2d, p["attn_w_qkv"], p["attn_b_qkv"],
                       ln=(p["ln1_g"], p["ln1_b"]))
    attn = pallas_attention(qkv.reshape(B, L, 3 * D), n_heads, causal)
    # out-proj with fused residual add.
    x2d = fused_linear(attn.reshape(B * L, D), p["attn_w_out"], p["attn_b_out"],
                       residual=x2d)
    # LN2 fused into MLP fc1 (+ exact GELU); fc2 with fused residual add.
    h = fused_linear(x2d, p["mlp_w1"], p["mlp_b1"],
                     ln=(p["ln2_g"], p["ln2_b"]), activation="gelu")
    x2d = fused_linear(h, p["mlp_w2"], p["mlp_b2"], residual=x2d)
    return x2d


def vision_forward(image, vp, cfg):
    # image: NCHW [B, 3, H, W]
    B, C, H, W = image.shape
    ps, width, heads = cfg["patch_size"], cfg["width"], cfg["heads"]
    gh, gw = H // ps, W // ps
    # conv1 (stride=kernel=patch_size, no bias) == im2col + matmul
    # TODO(synk): im2col patch extraction stays in JAX glue (pure layout reshuffle).
    patches = (image.reshape(B, C, gh, ps, gw, ps)
                    .transpose(0, 2, 4, 1, 3, 5)
                    .reshape(B * gh * gw, C * ps * ps))
    x = fused_linear(patches, vp["conv_w"]).reshape(B, gh * gw, width)
    cls = jnp.broadcast_to(vp["class_emb"].reshape(1, 1, width), (B, 1, width))
    x = jnp.concatenate([cls, x], axis=1) + vp["pos_emb"][None]     # [B, L, width]
    L = gh * gw + 1
    x2d = pallas_layernorm(x.reshape(B * L, width), vp["ln_pre_g"], vp["ln_pre_b"])
    for blk in vp["blocks"]:
        x2d = residual_block(x2d, B, L, blk, heads, causal=False)
    pooled = x2d.reshape(B, L, width)[:, 0]                         # CLS token
    # ln_post + projection + L2-normalize fused into one kernel.
    return fused_linear(pooled, vp["proj"],
                        ln=(vp["ln_post_g"], vp["ln_post_b"]), l2_normalize=True)


def text_forward(text, tp, cfg):
    B, L = text.shape
    width, heads = cfg["width"], cfg["heads"]
    # TODO(synk): token-embedding gather stays in JAX glue.
    x = jnp.take(tp["tok_emb"], text, axis=0) + tp["pos_emb"][None]
    x2d = x.reshape(B * L, width).astype(jnp.float32)
    for blk in tp["blocks"]:
        x2d = residual_block(x2d, B, L, blk, heads, causal=True)    # causal mask in-kernel
    eot = jnp.argmax(text, axis=-1)                                 # EOT = highest token id
    pooled = x2d.reshape(B, L, width)[jnp.arange(B), eot]           # [B, width]
    # ln_final is per-token, so applying it only to the pooled rows is identical;
    # fused into the text projection (no bias) along with the L2-normalize.
    return fused_linear(pooled, tp["text_proj"],
                        ln=(tp["ln_final_g"], tp["ln_final_b"]), l2_normalize=True)


def custom_text_clip_forward(params, image, text):
    image_features = vision_forward(image, params["visual"], params["vision_cfg"])
    text_features = text_forward(text, params["text"], params["text_cfg"])
    return image_features, text_features, jnp.exp(params["logit_scale"])


# ------------------------------- parameter init ------------------------------

def _normal(key, shape, std=0.02, dtype=jnp.float32):
    return (std * jax.random.normal(key, shape, jnp.float32)).astype(dtype)


def init_block(key, width, mlp_hidden):
    ks = jax.random.split(key, 4)
    bf16 = jnp.bfloat16
    return dict(
        ln1_g=jnp.ones((width,), jnp.float32), ln1_b=jnp.zeros((width,), jnp.float32),
        # Weights stored pre-transposed to [K, N] and in bf16 (MXU operand dtype);
        # no per-forward `.T` / dtype casts of weights.
        attn_w_qkv=_normal(ks[0], (width, 3 * width), dtype=bf16),
        attn_b_qkv=jnp.zeros((3 * width,), jnp.float32),
        attn_w_out=_normal(ks[1], (width, width), dtype=bf16),
        attn_b_out=jnp.zeros((width,), jnp.float32),
        ln2_g=jnp.ones((width,), jnp.float32), ln2_b=jnp.zeros((width,), jnp.float32),
        mlp_w1=_normal(ks[2], (width, mlp_hidden), dtype=bf16),
        mlp_b1=jnp.zeros((mlp_hidden,), jnp.float32),
        mlp_w2=_normal(ks[3], (mlp_hidden, width), dtype=bf16),
        mlp_b2=jnp.zeros((width,), jnp.float32),
    )


def init_params(key, embed_dim, vision_cfg, text_cfg):
    kv, kt = jax.random.split(key)
    bf16 = jnp.bfloat16
    # ---- vision tower ----
    vks = jax.random.split(kv, 4 + vision_cfg["layers"])
    vw = vision_cfg["width"]
    ps = vision_cfg["patch_size"]
    grid = vision_cfg["image_size"] // ps
    mlp_hidden = int(vw * vision_cfg["mlp_ratio"])
    visual = dict(
        conv_w=_normal(vks[0], (3 * ps * ps, vw), dtype=bf16),      # [C*ps*ps, width]
        class_emb=_normal(vks[1], (vw,), std=vw ** -0.5),
        pos_emb=_normal(vks[2], (grid * grid + 1, vw), std=vw ** -0.5),
        ln_pre_g=jnp.ones((vw,), jnp.float32), ln_pre_b=jnp.zeros((vw,), jnp.float32),
        ln_post_g=jnp.ones((vw,), jnp.float32), ln_post_b=jnp.zeros((vw,), jnp.float32),
        proj=_normal(vks[3], (vw, embed_dim), std=vw ** -0.5, dtype=bf16),
        blocks=[init_block(vks[4 + i], vw, mlp_hidden) for i in range(vision_cfg["layers"])],
    )
    # ---- text tower ----
    tks = jax.random.split(kt, 3 + text_cfg["layers"])
    tw = text_cfg["width"]
    text = dict(
        tok_emb=_normal(tks[0], (text_cfg["vocab_size"], tw)),
        pos_emb=_normal(tks[1], (text_cfg["context_length"], tw), std=0.01),
        ln_final_g=jnp.ones((tw,), jnp.float32), ln_final_b=jnp.zeros((tw,), jnp.float32),
        text_proj=_normal(tks[2], (tw, embed_dim), std=tw ** -0.5, dtype=bf16),
        blocks=[init_block(tks[3 + i], tw, tw * 4) for i in range(text_cfg["layers"])],
    )
    return dict(
        visual=visual,
        text=text,
        vision_cfg=vision_cfg,
        text_cfg=text_cfg,
        logit_scale=jnp.asarray(math.log(1.0 / 0.07), jnp.float32),
    )


# ------------------------------------ main ------------------------------------

if __name__ == "__main__":
    embed_dim = 16
    vision_cfg = dict(image_size=16, patch_size=4, width=32, layers=2,
                      heads=2, mlp_ratio=4.0)                 # head_width = 16
    text_cfg = dict(context_length=8, vocab_size=64, width=32, layers=2, heads=2)

    key = jax.random.PRNGKey(0)
    k_params, k_img, k_txt = jax.random.split(key, 3)
    params = init_params(k_params, embed_dim, vision_cfg, text_cfg)

    image = jax.random.normal(k_img, (2, 3, 16, 16), jnp.float32)   # NCHW
    text = jax.random.randint(k_txt, (2, 8), 0, text_cfg["vocab_size"], jnp.int32)

    img_f, txt_f, logit_scale = custom_text_clip_forward(params, image, text)
    jax.block_until_ready((img_f, txt_f, logit_scale))

    assert img_f.shape == (2, embed_dim) and txt_f.shape == (2, embed_dim)
    # Sanity: outputs are unit-norm (F.normalize semantics).
    assert bool(jnp.all(jnp.isfinite(img_f))) and bool(jnp.all(jnp.isfinite(txt_f)))
    print("KERNEL_OK")
</pallas_src>

<mosaic_0001>
module attributes {stable_mosaic.version = 11 : i64} {
  func.func @_fused_linear_kernel(%arg0: i32, %arg1: i32, %arg2: i32, %arg3: memref<32x48xf32, #tpu.memory_space<vmem>>, %arg4: memref<48x32xbf16, #tpu.memory_space<vmem>>, %arg5: memref<1x32xf32, #tpu.memory_space<vmem>>, %arg6: memref<32x32xf32, #tpu.memory_space<vmem>>, %arg7: memref<32x32xf32, #tpu.memory_space<vmem>>) attributes {dimension_semantics = [#tpu.dimension_semantics<parallel>, #tpu.dimension_semantics<parallel>, #tpu.dimension_semantics<arbitrary>], iteration_bounds = array<i64: 1, 1, 1>, scalar_prefetch = 0 : i64, scratch_operands = 1 : i64, tpu.core_type = #tpu.core_type<tc>, window_params = [{transform_indices = @transform_0, window_bounds = array<i64: 32, 48>}, {transform_indices = @transform_1, window_bounds = array<i64: 48, 32>}, {transform_indices = @transform_2, window_bounds = array<i64: 1, 32>}, {transform_indices = @transform_3, window_bounds = array<i64: 32, 32>}]} {
    %c0_i32 = arith.constant 0 : i32
    %0 = arith.cmpi eq, %arg2, %c0_i32 : i32
    %1 = arith.extui %0 : i1 to i32
    %c0_i32_0 = arith.constant 0 : i32
    %2 = arith.cmpi ne, %1, %c0_i32_0 : i32
    scf.if %2 {
      %cst_10 = arith.constant 0.000000e+00 : f32
      %13 = vector.broadcast %cst_10 : f32 to vector<32x32xf32>
      %c0_11 = arith.constant 0 : index
      %c0_12 = arith.constant 0 : index
      %14 = vector.load %arg7[%c0_11, %c0_12] : memref<32x32xf32, #tpu.memory_space<vmem>>, vector<32x32xf32>
      tpu.vector_store %arg7[%c0_11, %c0_12], %13 {strides = array<i32>} : memref<32x32xf32, #tpu.memory_space<vmem>>, vector<32x32xf32>,
    } else {
    }
    %c0 = arith.constant 0 : index
    %c0_1 = arith.constant 0 : index
    %3 = vector.load %arg3[%c0, %c0_1] : memref<32x48xf32, #tpu.memory_space<vmem>>, vector<32x48xf32>
    %c0_2 = arith.constant 0 : index
    %c0_3 = arith.constant 0 : index
    %4 = vector.load %arg7[%c0_2, %c0_3] : memref<32x32xf32, #tpu.memory_space<vmem>>, vector<32x32xf32>
    %5 = arith.truncf %3 : vector<32x48xf32> to vector<32x48xbf16>
    %c0_4 = arith.constant 0 : index
    %c0_5 = arith.constant 0 : index
    %6 = vector.load %arg4[%c0_4, %c0_5] : memref<48x32xbf16, #tpu.memory_space<vmem>>, vector<48x32xbf16>
    %cst = arith.constant dense<0.000000e+00> : vector<32x32xf32>
    %7 = tpu.matmul %5, %6, %cst {dimension_numbers = #tpu.dot_dimension_numbers<[1], [0], [0], [1], [0, 0, 1, 1], [], []>} : vector<32x48xbf16>, vector<48x32xbf16>, vector<32x32xf32> -> vector<32x32xf32>
    %8 = arith.addf %4, %7 : vector<32x32xf32>
    %c0_6 = arith.constant 0 : index
    %c0_7 = arith.constant 0 : index
    %9 = vector.load %arg7[%c0_6, %c0_7] : memref<32x32xf32, #tpu.memory_space<vmem>>, vector<32x32xf32>
    tpu.vector_store %arg7[%c0_6, %c0_7], %8 {strides = array<i32>} : memref<32x32xf32, #tpu.memory_space<vmem>>, vector<32x32xf32>,
    %c0_i32_8 = arith.constant 0 : i32
    %10 = arith.cmpi eq, %arg2, %c0_i32_8 : i32
    %11 = arith.extui %10 : i1 to i32
    %c0_i32_9 = arith.constant 0 : i32
    %12 = arith.cmpi ne, %11, %c0_i32_9 : i32
    scf.if %12 {
      %c0_10 = arith.constant 0 : index
      %c0_11 = arith.constant 0 : index
      %13 = vector.load %arg7[%c0_10, %c0_11] : memref<32x32xf32, #tpu.memory_space<vmem>>, vector<32x32xf32>
      %c0_12 = arith.constant 0 : index
      %c0_13 = arith.constant 0 : index
      %14 = vector.load %arg5[%c0_12, %c0_13] : memref<1x32xf32, #tpu.memory_space<vmem>>, vector<1x32xf32>
      %15 = vector.broadcast %14 : vector<1x32xf32> to vector<32x32xf32>
      %16 = arith.addf %13, %15 : vector<32x32xf32>
      %c0_14 = arith.constant 0 : index
      %c0_15 = arith.constant 0 : index
      %17 = vector.load %arg6[%c0_14, %c0_15] : memref<32x32xf32, #tpu.memory_space<vmem>>, vector<32x32xf32>
      tpu.vector_store %arg6[%c0_14, %c0_15], %16 {strides = array<i32>} : memref<32x32xf32, #tpu.memory_space<vmem>>, vector<32x32xf32>,
    } else {
    }
    return
  }
  func.func @transform_0(%arg0: i32, %arg1: i32, %arg2: i32) -> (i32, i32) {
    %c0_i32 = arith.constant 0 : i32
    return %arg0, %arg2 : i32, i32
  }
  func.func @transform_1(%arg0: i32, %arg1: i32, %arg2: i32) -> (i32, i32) {
    %c0_i32 = arith.constant 0 : i32
    return %arg2, %arg1 : i32, i32
  }
  func.func @transform_2(%arg0: i32, %arg1: i32, %arg2: i32) -> (i32, i32) {
    %c0_i32 = arith.constant 0 : i32
    %c0_i32_0 = arith.constant 0 : i32
    return %c0_i32, %arg1 : i32, i32
  }
  func.func @transform_3(%arg0: i32, %arg1: i32, %arg2: i32) -> (i32, i32) {
    %c0_i32 = arith.constant 0 : i32
    return %arg0, %arg1 : i32, i32
  }
}

</mosaic_0001>

<bundles_post_ra>
// kernel: tpu_custom_call.1
= control target key start
LH: loop header
LB: loop body
LE: loop exit
PB: predicated region body
PF: predicated region fallthrough
CT: control target
= control target key end

     0   :  { %8 = vsyncpa [#allocation4], 0  ;;  %s425_s0 = inlined_call_operand.hbm [shape: f32[32,48], index: 0, kind: input, shape index: {}]   ;;  %s426_s1 = inlined_call_operand.hbm [shape: bf16[48,32], index: 1, kind: input, shape index: {}]   ;;  %s427_s2 = inlined_call_operand.hbm [shape: f32[1,32], index: 2, kind: input, shape index: {}]   ;;  %s428_s3 = inlined_call_operand.hbm [shape: f32[32,32], index: 3, kind: output, shape index: {}]  }
   0x1   :  { %9 = vsyncpa [#allocation7], 0 }
   0x2   :  { %10 = vsyncpa [#allocation5], 0  ;;  %s330_s12 = smov [#allocation6]   ;;  %s236_s16 = scalar_lea.hbm %s426_s1, 384 }
   0x3   :  { %s28_s13 = sshll.u32 %s330_s12, 4  ;;  %p237_p0 = scmp.ne.s32.totalorder %s426_s1, %s236_s16  ;;  %s29_s13 = int_to_ptr.vmem [resolvable:$true] %s28_s13 }
   0x4   :  { %p240_p1 = scmp.lt.u32.totalorder %s236_s16, %s426_s1 }
   0x6   :  { %p242_p2 = pnand %p240_p1, %p237_p0 }
   0x8   :  { %245 = shalt.err (!%p242_p2)
}
   0x9   :  { %s246_s21 = scalar_lea.vmem %s29_s13, 384  ;;  %p251_p4 = scmp.lt.s32.totalorder %s29_s13, %s29_s13 }
   0xa   :  { %p247_p3 = scmp.ne.s32.totalorder %s29_s13, %s246_s21  ;;  %p252_p5 = scmp.lt.s32.totalorder %s246_s21, %s246_s21 }
   0xc   :  { %p253_p6 = por %p252_p5, %p251_p4 }
   0xe   :  { %p254_p7 = pnand %p253_p6, %p247_p3 }
  0x10   :  { %257 = shalt.err (!%p254_p7)
}
  0x11   :  { %s331_s22 = smov 64   ;;  %s332_s23 = smov 4  }
  0x12   :  { %34 = dma.hbm_to_vmem [thread:$0]  %s426_s1, 384, %s29_s13, [#allocation7], %s331_s22, %s331_s22, %s332_s23  }
  0x13   :  { %s333_s26 = smov [#allocation3]   ;;  %s258_s30 = scalar_lea.hbm %s425_s0, 512 }
  0x14   :  { %s16_s27 = sshll.u32 %s333_s26, 4  ;;  %p259_p8 = scmp.ne.s32.totalorder %s425_s0, %s258_s30  ;;  %s17_s27 = int_to_ptr.vmem [resolvable:$true] %s16_s27 }
  0x15   :  { %p262_p9 = scmp.lt.u32.totalorder %s258_s30, %s425_s0 }
  0x17   :  { %p264_p10 = pnand %p262_p9, %p259_p8 }
  0x19   :  { %267 = shalt.err (!%p264_p10)
}
  0x1a   :  { %s268_s8 = scalar_lea.vmem %s17_s27, 512  ;;  %p273_p12 = scmp.lt.s32.totalorder %s17_s27, %s17_s27 }
  0x1b   :  { %p269_p11 = scmp.ne.s32.totalorder %s17_s27, %s268_s8  ;;  %p274_p13 = scmp.lt.s32.totalorder %s268_s8, %s268_s8 }
  0x1d   :  { %p275_p0 = por %p274_p13, %p273_p12 }
  0x1f   :  { %p276_p1 = pnand %p275_p0, %p269_p11 }
  0x21   :  { %279 = shalt.err (!%p276_p1)
}
  0x22   :  { %s334_s1 = smov 128   ;;  %s335_s9 = smov 8  }
  0x23   :  { %22 = dma.hbm_to_vmem [thread:$0]  %s425_s0, 512, %s17_s27, [#allocation4], %s334_s1, %s334_s1, %s335_s9  }
  0x24   :  { %s336_s12 = smov [#allocation8]   ;;  %s280_s16 = scalar_lea.hbm %s427_s2, 16 }
  0x25   :  { %s41_s13 = sshll.u32 %s336_s12, 4  ;;  %p281_p2 = scmp.ne.s32.totalorder %s427_s2, %s280_s16  ;;  %s42_s13 = int_to_ptr.vmem [resolvable:$true] %s41_s13 }
  0x26   :  { %p284_p3 = scmp.lt.u32.totalorder %s280_s16, %s427_s2 }
  0x28   :  { %p286_p4 = pnand %p284_p3, %p281_p2 }
  0x2a   :  { %289 = shalt.err (!%p286_p4)
}
  0x2b   :  { %s290_s21 = scalar_lea.vmem %s42_s13, 16  ;;  %s294_s0 = scalar_lea.vmem %s42_s13, 32 }
  0x2c   :  { %p291_p5 = scmp.ne.s32.totalorder %s42_s13, %s290_s21  ;;  %p295_p6 = scmp.lt.s32.totalorder %s42_s13, %s42_s13 }
  0x2d   :  { %p296_p7 = scmp.lt.s32.totalorder %s294_s0, %s290_s21 }
  0x2f   :  { %p297_p8 = por %p296_p7, %p295_p6 }
  0x31   :  { %p298_p9 = pnand %p297_p8, %p291_p5 }
  0x33   :  { %301 = shalt.err (!%p298_p9)
}
  0x34   :  { %44 = dma.hbm_to_vmem [thread:$0]  %s427_s2, 16, %s42_s13, [#allocation7]  }
  0x35   :  { %324 = dma.done.wait [#allocation4], 512  }
  0x36   :  { %325 = vsyncadd [#allocation4], 4294966784 }
  0x37   :  { %326 = dma.done.wait [#allocation7], 400  }
  0x38   :  { %327 = vsyncadd [#allocation7], 4294966896  ;;  %vm59_vm0 = vcmask 261120   ;;  %v337_v0 = vmov 0.0   ;;  %v233_v1 = vld [vmem:[#allocation6] sm:$0xff]   ;;  %v234_v2 = vld [vmem:[#allocation6 + $0x8] sm:$0xff]  }
  0x39   :  { %62 = vst.msk [vmem:[#allocation2 + $0x10] sm:$0xff] %vm59_vm0, %v337_v0  ;;  %60 = vst.msk [vmem:[#allocation2] sm:$0xff] %vm59_vm0, %v337_v0  ;;  %214 = vmatprep.subr.bf16.mxu0 %v233_v1  ;;  %v64_v3 = vld [vmem:[#allocation3] sm:$0xff]  ;;  %v65_v4 = vld [vmem:[#allocation3 + $0x8] sm:$0xff]  ;;  %vm98_vm1 = vcmask 392192   ;;  %s338_s2 = smov [#allocation9]  }
  0x3a   :  { %61 = vst.msk [vmem:[#allocation2 + $0x8] sm:$0xff] %vm59_vm0, %v337_v0  ;;  %63 = vst.msk [vmem:[#allocation2 + $0x18] sm:$0xff] %vm59_vm0, %v337_v0  ;;  %215 = vmatpush3.bf16.msra.mxu0 %v233_v1  ;;  %v235_v5 = vld [vmem:[#allocation6 + $0x10] sm:$0xff]   ;;  %v72_v6 = vpack.c.bf16 %v65_v4, %v64_v3  ;;  %v67_v8 = vld [vmem:[#allocation3 + $0x18] sm:$0xff]  ;;  %s190_s24 = sshll.u32 %s338_s2, 4  ;;  %s191_s24 = int_to_ptr.vmem [resolvable:$true] %s190_s24 }
  0x3b   :  { %216 = vmatprep.subr.bf16.mxu0 %v234_v2  ;;  %v66_v7 = vld [vmem:[#allocation3 + $0x10] sm:$0xff]  ;;  %v208_v22 = vld [vmem:[#allocation8] ss:$0 sm:$0xff]  ;;  %s302_s25 = scalar_lea.vmem %s191_s24, 512  ;;  %p307_p11 = scmp.lt.s32.totalorder %s191_s24, %s191_s24 }
  0x3c   :  { %220 = vmatprep.mubr.msk.bf16.mxu0 %vm98_vm1, %v72_v6  ;;  %v73_v9 = vpack.c.bf16 %v67_v8, %v66_v7  ;;  %p303_p10 = scmp.ne.s32.totalorder %s191_s24, %s302_s25  ;;  %p308_p12 = scmp.lt.s32.totalorder %s302_s25, %s302_s25 }
  0x3e   :  { %217 = vmatpush3.bf16.msra.mxu0 %v234_v2  ;;  %p309_p13 = por %p308_p12, %p307_p11 }
  0x3f   :  { %218 = vmatprep.subr.bf16.mxu0 %v235_v5 }
  0x40   :  { %v70_v10 = vld [vmem:[#allocation2 + $0x10] sm:$0xff]  ;;  %v68_v11 = vld [vmem:[#allocation2] sm:$0xff]  ;;  %p310_p0 = pnand %p309_p13, %p303_p10 }
  0x41   :  { %v71_v13 = vld [vmem:[#allocation2 + $0x18] sm:$0xff]  ;;  %v69_v16 = vld [vmem:[#allocation2 + $0x8] sm:$0xff] }
  0x42   :  { %219 = vmatpush3.bf16.msra.mxu0 %v235_v5 }
  0x45   :  { %221 = vmatmul.mubr.msk.bf16.vlgmr.msra.gmra.mrb[0].mxu0 %vm98_vm1, %v73_v9 }
 0x118   :  { %v222_v12 = vpop.f32.mrb[0].mxu0 }
 0x119   :  { %v156_v14 = vadd.f32 %v222_v12, %v70_v10  ;;  %v139_v15 = vpop.f32.mrb[1].mxu0 }
 0x11a   :  { %v154_v17 = vadd.f32 %v139_v15, %v68_v11  ;;  %v223_v18 = vpop.f32.mrb[2].mxu0 }
 0x11b   :  { %161 = vst.msk [vmem:[#allocation2 + $0x10] sm:$0xff] %vm59_vm0, %v156_v14  ;;  %v157_v19 = vadd.f32 %v223_v18, %v71_v13  ;;  %v142_v20 = vpop.f32.mrb[3].mxu0 }
 0x11c   :  { %159 = vst.msk [vmem:[#allocation2] sm:$0xff] %vm59_vm0, %v154_v17  ;;  %v155_v21 = vadd.f32 %v142_v20, %v69_v16 }
 0x11d   :  { %162 = vst.msk [vmem:[#allocation2 + $0x18] sm:$0xff] %vm59_vm0, %v157_v19 }
 0x11e   :  { %160 = vst.msk [vmem:[#allocation2 + $0x8] sm:$0xff] %vm59_vm0, %v155_v21 }
 0x122   :  { %v168_v23 = vld [vmem:[#allocation2 + $0x10] sm:$0xff] }
 0x123   :  { %v166_v24 = vld [vmem:[#allocation2] sm:$0xff]  ;;  %v179_v25 = vadd.f32 %v208_v22, %v168_v23 }
 0x124   :  { %v169_v26 = vld [vmem:[#allocation2 + $0x18] sm:$0xff]  ;;  %v177_v27 = vadd.f32 %v208_v22, %v166_v24 }
 0x125   :  { %v167_v28 = vld [vmem:[#allocation2 + $0x8] sm:$0xff]  ;;  %v180_v29 = vadd.f32 %v208_v22, %v169_v26  ;;  %183 = vst.msk [vmem:[#allocation9 + $0x10] sm:$0xff] %vm59_vm0, %v179_v25 }
 0x126   :  { %v178_v30 = vadd.f32 %v208_v22, %v167_v28  ;;  %181 = vst.msk [vmem:[#allocation9] sm:$0xff] %vm59_vm0, %v177_v27 }
 0x127   :  { %184 = vst.msk [vmem:[#allocation9 + $0x18] sm:$0xff] %vm59_vm0, %v180_v29 }
 0x128   :  { %182 = vst.msk [vmem:[#allocation9 + $0x8] sm:$0xff] %vm59_vm0, %v178_v30 }
 0x129   :  { %313 = shalt.err (!%p310_p0)
}
 0x12a   :  { %s314_s28 = scalar_lea.hbm %s428_s3, 512 }
 0x12b   :  { %p315_p1 = scmp.ne.s32.totalorder %s428_s3, %s314_s28  ;;  %p318_p2 = scmp.lt.u32.totalorder %s314_s28, %s428_s3 }
 0x12d   :  { %p320_p3 = pnand %p318_p2, %p315_p1 }
 0x12f   :  { %323 = shalt.err (!%p320_p3)
}
 0x130   :  { %196 = dma.vmem_to_hbm [thread:$0]  %s191_s24, 512, %s428_s3, [#allocation5], %s334_s1, %s334_s1, %s335_s9  }
 0x131   :  { %328 = dma.done.wait [#allocation5], 512  }
 0x132   :  { %329 = vsyncadd [#allocation5], 4294966784 }
 0x133   :  { %200 = vsyncpa [#allocation4], 1 }
 0x134   :  { %201 = vsyncpa [#allocation7], 1 }
 0x135   :  { %202 = vsyncpa [#allocation5], 1 }

</bundles_post_ra>
